<compile_context>
chip_gen: v5e
topology: v5e:2x2
jax: 0.10.0
libtpu: 0.0.40
codegen_flags: <defaults>
</compile_context>

<pallas_src>
import functools

import numpy as np
import jax
import jax.numpy as jnp
from jax.experimental import pallas as pl
from jax.experimental.pallas import tpu as pltpu


def _loss_kernel(x_ref, tgt_ref, ls_ref, coeff_ref, out_ref,
                 *, num_classes, num_t, inv_n, lamb, L):
    # x_ref:     (C, T*N) f32 logits as lane-dense class planes
    # tgt_ref:   (1, T*N) i32 class ids, tiled T times (matches x flatten order)
    # ls_ref:    (C, N*T) f32 log-probs (native (C,N,T) layout, contiguous flatten)
    # coeff_ref: (1, T*N) f32 exp(-max(0, time-t-1)/20), repeated N times per t
    # out_ref:   (1, 2)   f32 -> [loss, lamb*loss_soft/L]
    x = x_ref[...]                                   # (C, TN)
    tgt = tgt_ref[...]                               # (1, TN) int32
    tgt_f = tgt.astype(jnp.float32)
    coeff = coeff_ref[...]                           # (1, TN)

    planes = [x[c:c + 1, :] for c in range(num_classes)]   # each (1, TN)

    # ---- cross-entropy term: max-stabilized logsumexp, all on full-width rows ----
    m = planes[0]
    for p in planes[1:]:
        m = jnp.maximum(m, p)
    s = jnp.exp(planes[0] - m)
    for p in planes[1:]:
        s = s + jnp.exp(p - m)
    lse = m + jnp.log(s)                             # (1, TN)

    if num_classes == 2:
        picked = jnp.where(tgt == 1, planes[1], planes[0])
    else:
        picked = jnp.where(tgt == 0, planes[0], 0.0)
        for c in range(1, num_classes):
            picked = picked + jnp.where(tgt == c, planes[c], 0.0)
    ce = lse - picked                                # (1, TN)

    weight = 1.0 + coeff * tgt_f                     # (1, TN)
    loss_exp = jnp.sum(ce * weight, axis=1, keepdims=True) * inv_n   # (1, 1), single lane reduce

    # ---- entropy (soft) term: sum_t mean_n(1 - ent) == T - (1/N) * sum(exp(ls)*ls) ----
    ls = ls_ref[...]                                 # (C, NT)
    ent = jnp.exp(ls) * ls
    ent_sum = jnp.sum(jnp.sum(ent, axis=1, keepdims=True), axis=0, keepdims=True)  # (1, 1)
    loss_soft = float(num_t) - inv_n * ent_sum       # (1, 1)

    soft_term = (lamb / L) * loss_soft
    out_ref[:, 0:1] = loss_exp + soft_term
    out_ref[:, 1:2] = soft_term


def custom_loss_forward(outputs, targets, log_softmax, *, time, L, lamb=0.0):
    """outputs: (T, N, C) f32; targets: (N,) int; log_softmax: (C, N, T) f32."""
    T, N, C = outputs.shape
    TN = T * N

    # Layout plumbing only (no compute hoisted into the wrapper):
    #  - logits as lane-dense class planes (C, T*N): transpose + contiguous reshape
    #  - log_softmax: contiguous (free) reshape of its native (C, N, T) layout
    #  - targets tiled to match the (t, n) flatten order of the logit planes
    #  - coeff is a static host constant (time/T static), no in-kernel transcendentals for it
    x_planes = jnp.transpose(outputs.astype(jnp.float32), (2, 0, 1)).reshape(C, TN)
    ls_planes = log_softmax.astype(jnp.float32).reshape(C, TN)
    tgt_flat = jnp.tile(targets.astype(jnp.int32), T).reshape(1, TN)
    coeff_flat = jnp.asarray(
        np.repeat(np.exp(-np.maximum(0.0, float(time) - np.arange(T) - 1.0) / 20.0), N),
        dtype=jnp.float32).reshape(1, TN)

    kernel = functools.partial(_loss_kernel, num_classes=C, num_t=T,
                               inv_n=1.0 / float(N), lamb=float(lamb), L=float(L))

    vmem = pltpu.MemorySpace.VMEM
    out = pl.pallas_call(
        kernel,
        out_shape=jax.ShapeDtypeStruct((1, 2), jnp.float32),
        in_specs=[pl.BlockSpec(memory_space=vmem)] * 4,
        out_specs=pl.BlockSpec(memory_space=vmem),
    )(x_planes, tgt_flat, ls_planes, coeff_flat)

    return out[0, 0], out[0, 1]


def _reference_forward(outputs, targets, log_softmax, *, time, L, lamb=0.0):
    """Plain-JAX replica of the PyTorch forward, for verification."""
    T, N, C = outputs.shape
    loss_exp = 0.0
    for i in range(T):
        logp = jax.nn.log_softmax(outputs[i], axis=-1)
        ce = -logp[jnp.arange(N), targets]
        coeff = np.exp(-max(0, time - i - 1) / 20.0)
        loss_exp = loss_exp + jnp.mean(ce + coeff * ce * targets.astype(jnp.float32))
    loss_soft = 0.0
    for t in range(log_softmax.shape[2]):
        alpha = log_softmax[:, :, t]                        # (C, N)
        loss_soft = loss_soft + jnp.mean(1.0 - (jnp.exp(alpha) * alpha).sum(0))
    soft_term = lamb * loss_soft / L
    return loss_exp + soft_term, soft_term


if __name__ == "__main__":
    # small shapes consistent with the module: T=8 time steps, N=16 samples, C=2 classes
    T, N, C = 8, 16, 2
    TIME, L, LAMB = T, float(T), 0.5

    key = jax.random.PRNGKey(0)
    k1, k2, k3 = jax.random.split(key, 3)

    outputs = jax.random.normal(k1, (T, N, C), dtype=jnp.float32)          # per-step logits
    targets = jax.random.randint(k2, (N,), 0, C, dtype=jnp.int32)          # class ids in {0,1}
    # log-probabilities over classes, stored in PyTorch (C, N, T) layout
    log_softmax = jnp.transpose(
        jax.nn.log_softmax(jax.random.normal(k3, (T, N, C), dtype=jnp.float32), axis=-1),
        (2, 1, 0))

    loss, soft = custom_loss_forward(outputs, targets, log_softmax,
                                     time=TIME, L=L, lamb=LAMB)
    loss = jax.block_until_ready(loss)
    soft = jax.block_until_ready(soft)

    loss_ref, soft_ref = _reference_forward(outputs, targets, log_softmax,
                                            time=TIME, L=L, lamb=LAMB)
    assert np.allclose(np.asarray(loss), np.asarray(loss_ref), rtol=1e-5, atol=1e-5), \
        (loss, loss_ref)
    assert np.allclose(np.asarray(soft), np.asarray(soft_ref), rtol=1e-5, atol=1e-5), \
        (soft, soft_ref)

    print("KERNEL_OK")
</pallas_src>

<mosaic_0001>
module attributes {stable_mosaic.version = 11 : i64} {
  func.func @_loss_kernel(%arg0: memref<2x128xf32, #tpu.memory_space<vmem>>, %arg1: memref<1x128xi32, #tpu.memory_space<vmem>>, %arg2: memref<2x128xf32, #tpu.memory_space<vmem>>, %arg3: memref<1x128xf32, #tpu.memory_space<vmem>>, %arg4: memref<1x2xf32, #tpu.memory_space<vmem>>) attributes {dimension_semantics = [], scalar_prefetch = 0 : i64, scratch_operands = 0 : i64, tpu.core_type = #tpu.core_type<tc>} {
    %c0 = arith.constant 0 : index
    %c0_0 = arith.constant 0 : index
    %0 = vector.load %arg0[%c0, %c0_0] : memref<2x128xf32, #tpu.memory_space<vmem>>, vector<2x128xf32>
    %c0_1 = arith.constant 0 : index
    %c0_2 = arith.constant 0 : index
    %1 = vector.load %arg1[%c0_1, %c0_2] : memref<1x128xi32, #tpu.memory_space<vmem>>, vector<1x128xi32>
    %2 = arith.sitofp %1 : vector<1x128xi32> to vector<1x128xf32>
    %c0_3 = arith.constant 0 : index
    %c0_4 = arith.constant 0 : index
    %3 = vector.load %arg3[%c0_3, %c0_4] : memref<1x128xf32, #tpu.memory_space<vmem>>, vector<1x128xf32>
    %4 = vector.extract_strided_slice %0 {offsets = [0, 0], sizes = [1, 128], strides = [1, 1]} : vector<2x128xf32> to vector<1x128xf32>
    %5 = vector.extract_strided_slice %0 {offsets = [1, 0], sizes = [1, 128], strides = [1, 1]} : vector<2x128xf32> to vector<1x128xf32>
    %6 = arith.maximumf %4, %5 : vector<1x128xf32>
    %7 = arith.subf %4, %6 : vector<1x128xf32>
    %8 = math.exp %7 : vector<1x128xf32>
    %9 = arith.subf %5, %6 : vector<1x128xf32>
    %10 = math.exp %9 : vector<1x128xf32>
    %11 = arith.addf %8, %10 : vector<1x128xf32>
    %12 = math.log %11 : vector<1x128xf32>
    %13 = arith.addf %6, %12 : vector<1x128xf32>
    %c1_i32 = arith.constant 1 : i32
    %14 = vector.broadcast %c1_i32 : i32 to vector<1x128xi32>
    %15 = arith.cmpi eq, %1, %14 : vector<1x128xi32>
    %16 = arith.select %15, %5, %4 : vector<1x128xi1>, vector<1x128xf32>
    %17 = arith.subf %13, %16 : vector<1x128xf32>
    %18 = arith.mulf %3, %2 : vector<1x128xf32>
    %cst = arith.constant 1.000000e+00 : f32
    %19 = vector.broadcast %cst : f32 to vector<1x128xf32>
    %20 = arith.addf %19, %18 : vector<1x128xf32>
    %21 = arith.mulf %17, %20 : vector<1x128xf32>
    %cst_5 = arith.constant dense<0.000000e+00> : vector<1xf32>
    %22 = vector.multi_reduction <add>, %21, %cst_5 [1] : vector<1x128xf32> to vector<1xf32>
    %23 = vector.shape_cast %22 : vector<1xf32> to vector<1x1xf32>
    %cst_6 = arith.constant 6.250000e-02 : f32
    %24 = vector.broadcast %cst_6 : f32 to vector<1x1xf32>
    %25 = arith.mulf %23, %24 : vector<1x1xf32>
    %c0_7 = arith.constant 0 : index
    %c0_8 = arith.constant 0 : index
    %26 = vector.load %arg2[%c0_7, %c0_8] : memref<2x128xf32, #tpu.memory_space<vmem>>, vector<2x128xf32>
    %27 = math.exp %26 : vector<2x128xf32>
    %28 = arith.mulf %27, %26 : vector<2x128xf32>
    %cst_9 = arith.constant dense<0.000000e+00> : vector<2xf32>
    %29 = vector.multi_reduction <add>, %28, %cst_9 [1] : vector<2x128xf32> to vector<2xf32>
    %30 = vector.shape_cast %29 : vector<2xf32> to vector<2x1xf32>
    %cst_10 = arith.constant dense<0.000000e+00> : vector<1xf32>
    %31 = vector.multi_reduction <add>, %30, %cst_10 [0] : vector<2x1xf32> to vector<1xf32>
    %32 = vector.shape_cast %31 : vector<1xf32> to vector<1x1xf32>
    %cst_11 = arith.constant 6.250000e-02 : f32
    %33 = vector.broadcast %cst_11 : f32 to vector<1x1xf32>
    %34 = arith.mulf %33, %32 : vector<1x1xf32>
    %cst_12 = arith.constant 8.000000e+00 : f32
    %35 = vector.broadcast %cst_12 : f32 to vector<1x1xf32>
    %36 = arith.subf %35, %34 : vector<1x1xf32>
    %cst_13 = arith.constant 6.250000e-02 : f32
    %37 = vector.broadcast %cst_13 : f32 to vector<1x1xf32>
    %38 = arith.mulf %37, %36 : vector<1x1xf32>
    %39 = arith.addf %25, %38 : vector<1x1xf32>
    %c0_14 = arith.constant 0 : index
    %c0_15 = arith.constant 0 : index
    %40 = vector.load %arg4[%c0_14, %c0_15] : memref<1x2xf32, #tpu.memory_space<vmem>>, vector<1x1xf32>
    tpu.vector_store %arg4[%c0_14, %c0_15], %39 {strides = array<i32>} : memref<1x2xf32, #tpu.memory_space<vmem>>, vector<1x1xf32>,
    %c0_16 = arith.constant 0 : index
    %c1 = arith.constant 1 : index
    %41 = vector.load %arg4[%c0_16, %c1] : memref<1x2xf32, #tpu.memory_space<vmem>>, vector<1x1xf32>
    tpu.vector_store %arg4[%c0_16, %c1], %38 {strides = array<i32>} : memref<1x2xf32, #tpu.memory_space<vmem>>, vector<1x1xf32>,
    return
  }
}

</mosaic_0001>

<bundles_post_ra>
// kernel: tpu_custom_call.1
= control target key start
LH: loop header
LB: loop body
LE: loop exit
PB: predicated region body
PF: predicated region fallthrough
CT: control target
= control target key end

     0   :  { %9 = vsyncpa [#allocation3], 0  ;;  %s299_s0 = inlined_call_operand.hbm [shape: f32[2,128], index: 0, kind: input, shape index: {}]   ;;  %s300_s1 = inlined_call_operand.hbm [shape: s32[1,128], index: 1, kind: input, shape index: {}]   ;;  %s301_s2 = inlined_call_operand.hbm [shape: f32[2,128], index: 2, kind: input, shape index: {}]   ;;  %s302_s3 = inlined_call_operand.vmem [shape: f32[1,128], index: 3, kind: input, shape index: {}]   ;;  %s303_s4 = inlined_call_operand.hbm [shape: f32[1,2], index: 4, kind: output, shape index: {}]  }
   0x1   :  { %10 = vsyncpa [#allocation6], 0  ;;  %s28_s17 = sshll.u32 %s300_s1, 4  ;;  %s29_s17 = int_to_ptr.hbm [resolvable:$true] %s28_s17 }
   0x2   :  { %11 = vsyncpa [#allocation4], 0  ;;  %s253_s18 = smov [#allocation5]   ;;  %s17_s22 = sshll.u32 %s299_s0, 4  ;;  %s18_s22 = int_to_ptr.hbm [resolvable:$true] %s17_s22 }
   0x3   :  { %s30_s19 = sshll.u32 %s253_s18, 4  ;;  %s254_s23 = smov [#allocation2]   ;;  %s31_s19 = int_to_ptr.vmem [resolvable:$true] %s30_s19 }
   0x4   :  { %33 = dma.hbm_to_vmem [thread:$0]  %s29_s17, 16, %s31_s19, [#allocation6]  }
   0x5   :  { %s19_s24 = sshll.u32 %s254_s23, 4  ;;  %s39_s27 = sshll.u32 %s301_s2, 4  ;;  %s20_s24 = int_to_ptr.vmem [resolvable:$true] %s19_s24  ;;  %s40_s27 = int_to_ptr.hbm [resolvable:$true] %s39_s27 }
   0x6   :  { %22 = dma.hbm_to_vmem [thread:$0]  %s18_s22, 32, %s20_s24, [#allocation3]  }
   0x7   :  { %s255_s1 = smov [#allocation7]  }
   0x8   :  { %s41_s28 = sshll.u32 %s255_s1, 4  ;;  %s42_s28 = int_to_ptr.vmem [resolvable:$true] %s41_s28 }
   0x9   :  { %44 = dma.hbm_to_vmem [thread:$0]  %s40_s27, 32, %s42_s28, [#allocation6]  }
   0xa   :  { %247 = dma.done.wait [#allocation3], 32  }
   0xb   :  { %248 = vsyncadd [#allocation3], 4294967264 }
   0xc   :  { %249 = dma.done.wait [#allocation6], 48  }
   0xd   :  { %250 = vsyncadd [#allocation6], 4294967248  ;;  %v98_v0 = vld [vmem:[#allocation7] sm:$0x3]  ;;  %v59_v1 = vld [vmem:[#allocation2] sm:$0x3] }
   0xe   :  { %v99_v2 = vmul.f32 1.442695, %v98_v0  ;;  %v64_v3 = vrot.slane %v59_v1, 1  ;;  %84 = vst [vmem:[#allocation1] sm:$0xff] %v59_v1  ;;  %vm102_vm0 = vcmask 1041408   ;;  %vm93_vm2 = vcmask 1040384  }
   0xf   :  { %v60_v16 = vld [vmem:[#allocation5] sm:$0x1]  ;;  %v62_v19 = vld [vmem:[%s302_s3] sm:$0x1]  ;;  %s256_s3 = smov [#allocation8]   ;;  %s128_s6 = sshll.u32 %s303_s4, 4  ;;  %s129_s6 = int_to_ptr.hbm [resolvable:$true] %s128_s6 }
  0x10   :  { %143 = vpow2.f32 %v99_v2  ;;  %v66_v4 = vmax.f32 %v59_v1, %v64_v3  ;;  %v61_v18 = vcvt.s32.f32 %v60_v16  ;;  %vm83_vm1 = vcmp.eq.s32.totalorder %v60_v16, 1  ;;  %s126_s29 = sshll.u32 %s256_s3, 4  ;;  %s127_s29 = int_to_ptr.vmem [resolvable:$true] %s126_s29 }
  0x11   :  { %vm117_vm3 = vcmask 0   ;;  %vm119_vm4 = vcmask 8200  }
  0x12   :  { %v67_v5 = vsub.f32 %v59_v1, %v66_v4  ;;  %v71_v6 = vrot.slane %v66_v4, 7  ;;  %v90_v21 = vmul.f32 %v62_v19, %v61_v18 }
  0x14   :  { %v68_v7 = vmul.f32 1.442695, %v67_v5  ;;  %v73_v8 = vsub.f32 %v59_v1, %v71_v6  ;;  %v91_v26 = vadd.f32 1.0, %v90_v21 }
  0x15   :  { %v86_v20 = vld [vmem:[#allocation1 + $0x1] ss:$9 sm:$0xff] }
  0x16   :  { %v144_v9 = vpop.eup %143  ;;  %v74_v10 = vmul.f32 1.442695, %v73_v8  ;;  %145 = vpow2.f32 %v68_v7  ;;  %v88_v24 = vsel %vm83_vm1, %v86_v20, %v59_v1 }
  0x17   :  { %v101_v11 = vmul.f32 %v144_v9, %v98_v0 }
  0x18   :  { %147 = vpow2.f32 %v74_v10 }
  0x19   :  { %v103_v12 = vsel %vm102_vm0, %v101_v11, 0.0 }
  0x1a   :  { %104 = vadd.xlane.f32.xlu0 %v103_v12 }
  0x1c   :  { %v146_v13 = vpop.eup %145 }
  0x1e   :  { %v148_v14 = vpop.eup %147 }
  0x1f   :  { %v77_v15 = vrot.slane %v148_v14, 1 }
  0x21   :  { %v79_v17 = vadd.f32 %v146_v13, %v77_v15 }
  0x23   :  { %149 = vlog2.f32 %v79_v17 }
  0x29   :  { %v150_v22 = vpop.eup %149 }
  0x2a   :  { %v81_v23 = vmul.f32 0.6931472, %v150_v22 }
  0x2c   :  { %v82_v25 = vadd.f32 %v81_v23, %v66_v4 }
  0x2e   :  { %v89_v27 = vsub.f32 %v82_v25, %v88_v24 }
  0x30   :  { %v92_v28 = vmul.f32 %v91_v26, %v89_v27 }
  0x32   :  { %v94_v29 = vsel %vm93_vm2, %v92_v28, 0.0 }
  0x33   :  { %95 = vadd.xlane.f32.xlu0 %v94_v29 }
  0x8d   :  { %v105_v30 = vpop.xlane.xlu0 %104 }
  0x8e   :  { %v106_v31 = vsel %vm102_vm0, %v105_v30, 0.0 }
  0x8f   :  { %v107_v32 = vrot.slane %v106_v31, 4 }
  0x91   :  { %v108_v33 = vadd.f32 %v107_v32, %v106_v31 }
  0x93   :  { %v109_v34 = vrot.slane %v108_v33, 2 }
  0x95   :  { %v110_v35 = vadd.f32 %v109_v34, %v108_v33 }
  0x97   :  { %v111_v36 = vrot.slane %v110_v35, 1 }
  0x99   :  { %v112_v37 = vadd.f32 %v111_v36, %v110_v35 }
  0x9b   :  { %v113_v38 = vmul.f32 0.0625, %v112_v37 }
  0x9d   :  { %v114_v39 = vsub.f32 8.0, %v113_v38 }
  0x9f   :  { %v115_v41 = vmul.f32 0.0625, %v114_v39 }
  0xa6   :  { %v96_v40 = vpop.xlane.xlu0 %95 }
  0xa7   :  { %v97_v42 = vmul.f32 0.0625, %v96_v40 }
  0xa9   :  { %v116_v43 = vadd.f32 %v115_v41, %v97_v42 }
  0xab   :  { %118 = vst.msk [vmem:[#allocation8] sm:$0x1] %vm117_vm3, %v116_v43 }
  0xac   :  { %120 = vst.msk [vmem:[#allocation8] sm:$0x1] %vm119_vm4, %v115_v41 }
  0xad   :  { %131 = dma.vmem_to_hbm [thread:$0]  %s127_s29, 16, %s129_s6, [#allocation4]  }
  0xae   :  { %251 = dma.done.wait [#allocation4], 16  }
  0xaf   :  { %252 = vsyncadd [#allocation4], 4294967280 }
  0xb0   :  { %136 = vsyncpa [#allocation3], 1 }
  0xb1   :  { %137 = vsyncpa [#allocation6], 1 }
  0xb2   :  { %138 = vsyncpa [#allocation4], 1 }

</bundles_post_ra>
